<compile_context>
chip_gen: v7x
topology: tpu7x:2x2x1
jax: 0.10.0
libtpu: 0.0.40
codegen_flags: <defaults>
</compile_context>

<pallas_src>
import functools

import jax
import jax.numpy as jnp
from jax.experimental import pallas as pl
from jax.experimental.pallas import tpu as pltpu

LANES = 128


def _round_up(n, m):
    return ((n + m - 1) // m) * m


def _mlp_kernel(x_ref, w_ref, b_ref, o_ref):
    """Fused 3-layer MLP on one batch tile.

    x_ref: [TILE_B, F]   (f32 or bf16), zero-padded features
    w_ref: [3, F, F]     (same dtype as x), zero-padded weights
    b_ref: [3, 1, F]     f32, zero-padded biases
    o_ref: [TILE_B, F]   f32, lane-dense padded output (col 0..out_dim-1 real)
    """
    wdt = w_ref.dtype

    # Layer 1: Linear + ReLU (f32 accumulate, f32 elementwise)
    h = jnp.dot(x_ref[...], w_ref[0], preferred_element_type=jnp.float32)
    h = jnp.maximum(h + b_ref[0], 0.0)

    # Layer 2: Linear + ReLU
    h = jnp.dot(h.astype(wdt), w_ref[1], preferred_element_type=jnp.float32)
    h = jnp.maximum(h + b_ref[1], 0.0)

    # Output layer: Linear + Tanh. The padded w3 already produces a 128-wide
    # lane-dense result, so the store is a full, unmasked [TILE_B, 128] write.
    h = jnp.dot(h.astype(wdt), w_ref[2], preferred_element_type=jnp.float32)
    o_ref[...] = jnp.tanh(h + b_ref[2]).astype(o_ref.dtype)


def _pack_params(params, feat_pad, dtype):
    """Pack the 3 weights / 3 biases into two zero-padded contiguous buffers."""
    ws = [params["w1"], params["w2"], params["w3"]]
    bs = [params["b1"], params["b2"], params["b3"]]
    w_packed = jnp.zeros((3, feat_pad, feat_pad), dtype)
    b_packed = jnp.zeros((3, 1, feat_pad), jnp.float32)
    for i, (w, b) in enumerate(zip(ws, bs)):
        w_packed = w_packed.at[i, : w.shape[0], : w.shape[1]].set(w.astype(dtype))
        b_packed = b_packed.at[i, :, : b.shape[1]].set(
            b.reshape(1, -1).astype(jnp.float32))
    return w_packed, b_packed


@functools.partial(jax.jit, static_argnames=("tile_b", "use_bf16"))
def simple_policy_network(x, params, *, tile_b=1024, use_bf16=True):
    """Forward pass of SimplePolicyNetwork via a single Pallas kernel.

    Args:
      x: [batch, input_dim] float32.
      params: dict with w1 [in,h1], b1 [1,h1], w2 [h1,h2], b2 [1,h2],
              w3 [h2,out], b3 [1,out]  (weights are transposed vs. nn.Linear).
      tile_b: batch tile size (static).
      use_bf16: feed bf16 operands to the MXU (f32 accumulation).
    Returns:
      [batch, output_dim] float32.
    """
    batch, input_dim = x.shape
    h1 = params["w1"].shape[1]
    h2 = params["w2"].shape[1]
    out_dim = params["w3"].shape[1]
    assert params["w1"].shape[0] == input_dim

    # Uniform padded feature width (all layer widths <= 128 here).
    feat_pad = _round_up(max(input_dim, h1, h2, out_dim), LANES)

    compute_dtype = jnp.bfloat16 if use_bf16 else jnp.float32
    w_packed, b_packed = _pack_params(params, feat_pad, compute_dtype)

    # Batch tiling: clip tile to the (8-rounded) batch, pad batch to a multiple.
    tile_b = min(tile_b, _round_up(batch, 8))
    padded_batch = _round_up(batch, tile_b)

    x_pad = jnp.zeros((padded_batch, feat_pad), compute_dtype)
    x_pad = x_pad.at[:batch, :input_dim].set(x.astype(compute_dtype))

    grid = (padded_batch // tile_b,)

    out_padded = pl.pallas_call(
        _mlp_kernel,
        out_shape=jax.ShapeDtypeStruct((padded_batch, feat_pad), jnp.float32),
        grid=grid,
        in_specs=[
            # x: tiled over batch, double-buffered by the Pallas pipeline.
            pl.BlockSpec((tile_b, feat_pad), lambda i: (i, 0)),
            # packed weights / biases: same block every step -> VMEM-resident.
            pl.BlockSpec((3, feat_pad, feat_pad), lambda i: (0, 0, 0)),
            pl.BlockSpec((3, 1, feat_pad), lambda i: (0, 0, 0)),
        ],
        # Lane-dense 128-wide output tile -> unmasked stores.
        out_specs=pl.BlockSpec((tile_b, feat_pad), lambda i: (i, 0)),
        compiler_params=pltpu.CompilerParams(
            dimension_semantics=("parallel",)),
    )(x_pad, w_packed, b_packed)

    return out_padded[:batch, :out_dim]


def init_params(key, input_dim=20, hidden_dims=(64, 32), output_dim=1):
    """Deterministic init matching nn.Linear's default U(-1/sqrt(fan_in), +)."""
    params = {}
    dims = [input_dim] + list(hidden_dims) + [output_dim]
    names = ["1", "2", "3"]
    for name, (fan_in, fan_out) in zip(names, zip(dims[:-1], dims[1:])):
        key, kw, kb = jax.random.split(key, 3)
        bound = 1.0 / jnp.sqrt(float(fan_in))
        params[f"w{name}"] = jax.random.uniform(
            kw, (fan_in, fan_out), jnp.float32, -bound, bound)
        params[f"b{name}"] = jax.random.uniform(
            kb, (1, fan_out), jnp.float32, -bound, bound)
    return params


def reference_forward(x, params):
    h1 = jnp.maximum(x @ params["w1"] + params["b1"], 0.0)
    h2 = jnp.maximum(h1 @ params["w2"] + params["b2"], 0.0)
    return jnp.tanh(h2 @ params["w3"] + params["b3"])


if __name__ == "__main__":
    key = jax.random.PRNGKey(0)
    key, kx = jax.random.split(key)

    batch, input_dim = 8, 20
    x = jax.random.normal(kx, (batch, input_dim), dtype=jnp.float32)
    params = init_params(key, input_dim=input_dim, hidden_dims=(64, 32),
                         output_dim=1)

    ref = reference_forward(x, params)

    # bf16-MXU path (default): loosened tolerance vs. the f32 reference.
    out = jax.block_until_ready(simple_policy_network(x, params))
    assert out.shape == (batch, 1), out.shape
    max_err = float(jnp.max(jnp.abs(out - ref)))
    assert max_err < 5e-2, max_err

    # Pure-f32 path matches the reference tightly.
    out_f32 = jax.block_until_ready(
        simple_policy_network(x, params, use_bf16=False))
    assert jnp.allclose(out_f32, ref, atol=1e-5, rtol=1e-5), (
        float(jnp.max(jnp.abs(out_f32 - ref))))

    print("KERNEL_OK")
</pallas_src>

<mosaic_0001>
module attributes {stable_mosaic.version = 11 : i64} {
  func.func @_mlp_kernel(%arg0: i32, %arg1: memref<8x128xbf16, #tpu.memory_space<vmem>>, %arg2: memref<3x128x128xbf16, #tpu.memory_space<vmem>>, %arg3: memref<3x1x128xf32, #tpu.memory_space<vmem>>, %arg4: memref<8x128xf32, #tpu.memory_space<vmem>>) attributes {dimension_semantics = [#tpu.dimension_semantics<parallel>], iteration_bounds = array<i64: 1>, scalar_prefetch = 0 : i64, scratch_operands = 0 : i64, tpu.core_type = #tpu.core_type<tc>, window_params = [{transform_indices = @transform_0, window_bounds = array<i64: 8, 128>}, {pipeline_mode = #tpu.pipeline_mode<synchronous>, transform_indices = @transform_1, window_bounds = array<i64: 3, 128, 128>}, {pipeline_mode = #tpu.pipeline_mode<synchronous>, transform_indices = @transform_2, window_bounds = array<i64: 3, 1, 128>}, {transform_indices = @transform_3, window_bounds = array<i64: 8, 128>}]} {
    %c0 = arith.constant 0 : index
    %c0_0 = arith.constant 0 : index
    %0 = vector.load %arg1[%c0, %c0_0] : memref<8x128xbf16, #tpu.memory_space<vmem>>, vector<8x128xbf16>
    %c0_1 = arith.constant 0 : index
    %c0_2 = arith.constant 0 : index
    %c0_3 = arith.constant 0 : index
    %1 = vector.load %arg2[%c0_1, %c0_2, %c0_3] : memref<3x128x128xbf16, #tpu.memory_space<vmem>>, vector<1x128x128xbf16>
    %2 = vector.shape_cast %1 : vector<1x128x128xbf16> to vector<128x128xbf16>
    %cst = arith.constant dense<0.000000e+00> : vector<8x128xf32>
    %3 = tpu.matmul %0, %2, %cst {dimension_numbers = #tpu.dot_dimension_numbers<[1], [0], [0], [1], [0, 0, 1, 1], [], []>} : vector<8x128xbf16>, vector<128x128xbf16>, vector<8x128xf32> -> vector<8x128xf32>
    %c0_4 = arith.constant 0 : index
    %c0_5 = arith.constant 0 : index
    %c0_6 = arith.constant 0 : index
    %4 = vector.load %arg3[%c0_4, %c0_5, %c0_6] : memref<3x1x128xf32, #tpu.memory_space<vmem>>, vector<1x1x128xf32>
    %5 = vector.shape_cast %4 : vector<1x1x128xf32> to vector<1x128xf32>
    %6 = vector.broadcast %5 : vector<1x128xf32> to vector<8x128xf32>
    %7 = arith.addf %3, %6 : vector<8x128xf32>
    %cst_7 = arith.constant 0.000000e+00 : f32
    %8 = vector.broadcast %cst_7 : f32 to vector<8x128xf32>
    %9 = arith.maximumf %7, %8 : vector<8x128xf32>
    %10 = arith.truncf %9 : vector<8x128xf32> to vector<8x128xbf16>
    %c1 = arith.constant 1 : index
    %c0_8 = arith.constant 0 : index
    %c0_9 = arith.constant 0 : index
    %11 = vector.load %arg2[%c1, %c0_8, %c0_9] : memref<3x128x128xbf16, #tpu.memory_space<vmem>>, vector<1x128x128xbf16>
    %12 = vector.shape_cast %11 : vector<1x128x128xbf16> to vector<128x128xbf16>
    %cst_10 = arith.constant dense<0.000000e+00> : vector<8x128xf32>
    %13 = tpu.matmul %10, %12, %cst_10 {dimension_numbers = #tpu.dot_dimension_numbers<[1], [0], [0], [1], [0, 0, 1, 1], [], []>} : vector<8x128xbf16>, vector<128x128xbf16>, vector<8x128xf32> -> vector<8x128xf32>
    %c1_11 = arith.constant 1 : index
    %c0_12 = arith.constant 0 : index
    %c0_13 = arith.constant 0 : index
    %14 = vector.load %arg3[%c1_11, %c0_12, %c0_13] : memref<3x1x128xf32, #tpu.memory_space<vmem>>, vector<1x1x128xf32>
    %15 = vector.shape_cast %14 : vector<1x1x128xf32> to vector<1x128xf32>
    %16 = vector.broadcast %15 : vector<1x128xf32> to vector<8x128xf32>
    %17 = arith.addf %13, %16 : vector<8x128xf32>
    %cst_14 = arith.constant 0.000000e+00 : f32
    %18 = vector.broadcast %cst_14 : f32 to vector<8x128xf32>
    %19 = arith.maximumf %17, %18 : vector<8x128xf32>
    %20 = arith.truncf %19 : vector<8x128xf32> to vector<8x128xbf16>
    %c2 = arith.constant 2 : index
    %c0_15 = arith.constant 0 : index
    %c0_16 = arith.constant 0 : index
    %21 = vector.load %arg2[%c2, %c0_15, %c0_16] : memref<3x128x128xbf16, #tpu.memory_space<vmem>>, vector<1x128x128xbf16>
    %22 = vector.shape_cast %21 : vector<1x128x128xbf16> to vector<128x128xbf16>
    %cst_17 = arith.constant dense<0.000000e+00> : vector<8x128xf32>
    %23 = tpu.matmul %20, %22, %cst_17 {dimension_numbers = #tpu.dot_dimension_numbers<[1], [0], [0], [1], [0, 0, 1, 1], [], []>} : vector<8x128xbf16>, vector<128x128xbf16>, vector<8x128xf32> -> vector<8x128xf32>
    %c2_18 = arith.constant 2 : index
    %c0_19 = arith.constant 0 : index
    %c0_20 = arith.constant 0 : index
    %24 = vector.load %arg3[%c2_18, %c0_19, %c0_20] : memref<3x1x128xf32, #tpu.memory_space<vmem>>, vector<1x1x128xf32>
    %25 = vector.shape_cast %24 : vector<1x1x128xf32> to vector<1x128xf32>
    %26 = vector.broadcast %25 : vector<1x128xf32> to vector<8x128xf32>
    %27 = arith.addf %23, %26 : vector<8x128xf32>
    %28 = math.tanh %27 : vector<8x128xf32>
    %c0_21 = arith.constant 0 : index
    %c0_22 = arith.constant 0 : index
    %29 = vector.load %arg4[%c0_21, %c0_22] : memref<8x128xf32, #tpu.memory_space<vmem>>, vector<8x128xf32>
    tpu.vector_store %arg4[%c0_21, %c0_22], %28 {strides = array<i32>} : memref<8x128xf32, #tpu.memory_space<vmem>>, vector<8x128xf32>,
    return
  }
  func.func @transform_0(%arg0: i32) -> (i32, i32) {
    %c0_i32 = arith.constant 0 : i32
    %c0_i32_0 = arith.constant 0 : i32
    return %arg0, %c0_i32 : i32, i32
  }
  func.func @transform_1(%arg0: i32) -> (i32, i32, i32) {
    %c0_i32 = arith.constant 0 : i32
    %c0_i32_0 = arith.constant 0 : i32
    %c0_i32_1 = arith.constant 0 : i32
    %c0_i32_2 = arith.constant 0 : i32
    return %c0_i32, %c0_i32_0, %c0_i32_1 : i32, i32, i32
  }
  func.func @transform_2(%arg0: i32) -> (i32, i32, i32) {
    %c0_i32 = arith.constant 0 : i32
    %c0_i32_0 = arith.constant 0 : i32
    %c0_i32_1 = arith.constant 0 : i32
    %c0_i32_2 = arith.constant 0 : i32
    return %c0_i32, %c0_i32_0, %c0_i32_1 : i32, i32, i32
  }
  func.func @transform_3(%arg0: i32) -> (i32, i32) {
    %c0_i32 = arith.constant 0 : i32
    %c0_i32_0 = arith.constant 0 : i32
    return %arg0, %c0_i32 : i32, i32
  }
}

</mosaic_0001>

<bundles_post_ra>
// kernel: simple_policy_network.1
= control target key start
LH: loop header
LB: loop body
LE: loop exit
PB: predicated region body
PF: predicated region fallthrough
CT: control target
= control target key end

     0   :  { %v539_v0 = vmov 0.0   ;;  %vm540_vm0 = vmmov 0   ;;  %s678_s1 = inlined_call_operand.vmem [shape: bf16[3,128,128], index: 1, kind: input, shape index: {}]   ;;  %s679_s0 = inlined_call_operand.vmem [shape: bf16[8,128], index: 0, kind: input, shape index: {}]   ;;  %s680_s2 = inlined_call_operand.vmem [shape: f32[3,1,128], index: 2, kind: input, shape index: {}]   ;;  %s681_s3 = inlined_call_operand.vmem [shape: f32[8,128], index: 3, kind: output, shape index: {}]  }
   0x1   :  { %451 = vmatprep.subr.bf16.mxu0 %v539_v0  ;;  %v513_v1 = vld [vmem:[%s678_s1] sm:$0xff]   ;;  %467 = vmatprep.mubr.msk.bf16.mxu0 %vm540_vm0, %v539_v0  ;;  %v514_v2 = vld [vmem:[%s678_s1 + $0x8] sm:$0xff]   ;;  %v515_v3 = vld [vmem:[%s678_s1 + $0x10] sm:$0xff]  }
   0x2   :  { %471 = vmatprep.subr.bf16.mxu1 %v539_v0  ;;  %487 = vmatprep.mubr.msk.bf16.mxu1 %vm540_vm0, %v539_v0  ;;  %v521_v4 = vld [vmem:[%s678_s1 + $0x40] sm:$0xff]   ;;  %v516_v5 = vld [vmem:[%s678_s1 + $0x18] sm:$0xff]   ;;  %v522_v6 = vld [vmem:[%s678_s1 + $0x48] sm:$0xff]  }
   0x3   :  { %452 = vmatpush3.bf16.msra.mxu0 %v513_v1  ;;  %472 = vmatpush3.bf16.msra.mxu1 %v521_v4  ;;  %v517_v7 = vld [vmem:[%s678_s1 + $0x20] sm:$0xff]   ;;  %v523_v8 = vld [vmem:[%s678_s1 + $0x50] sm:$0xff]   ;;  %v518_v9 = vld [vmem:[%s678_s1 + $0x28] sm:$0xff]  }
   0x4   :  { %453 = vmatprep.subr.bf16.mxu0 %v539_v0  ;;  %473 = vmatprep.subr.bf16.mxu1 %v539_v0  ;;  %v524_v10 = vld [vmem:[%s678_s1 + $0x58] sm:$0xff]   ;;  %v519_v11 = vld [vmem:[%s678_s1 + $0x30] sm:$0xff]   ;;  %v525_v12 = vld [vmem:[%s678_s1 + $0x60] sm:$0xff]  }
   0x5   :  { %v520_v13 = vld [vmem:[%s678_s1 + $0x38] sm:$0xff]   ;;  %v526_v14 = vld [vmem:[%s678_s1 + $0x68] sm:$0xff]   ;;  %v15_v15 = vld [vmem:[%s679_s0] sm:$0xf] }
   0x6   :  { %v527_v16 = vld [vmem:[%s678_s1 + $0x70] sm:$0xff]   ;;  %v528_v17 = vld [vmem:[%s678_s1 + $0x78] sm:$0xff]   ;;  %v529_v18 = vld [vmem:[%s678_s1 + $0x80] sm:$0xff]  }
   0x7   :  { %454 = vmatpush3.bf16.msra.mxu0 %v514_v2  ;;  %474 = vmatpush3.bf16.msra.mxu1 %v522_v6  ;;  %v530_v19 = vld [vmem:[%s678_s1 + $0x88] sm:$0xff]   ;;  %v531_v20 = vld [vmem:[%s678_s1 + $0x90] sm:$0xff]   ;;  %v532_v21 = vld [vmem:[%s678_s1 + $0x98] sm:$0xff]  }
   0x8   :  { %455 = vmatprep.subr.bf16.mxu0 %v539_v0  ;;  %475 = vmatprep.subr.bf16.mxu1 %v539_v0  ;;  %v533_v22 = vld [vmem:[%s678_s1 + $0xa0] sm:$0xff]   ;;  %v534_v23 = vld [vmem:[%s678_s1 + $0xa8] sm:$0xff]   ;;  %v535_v32 = vld [vmem:[%s678_s1 + $0xb0] sm:$0xff]  }
   0x9   :  { %v363_v24 = vld [vmem:[%s680_s2] ss:$0 sm:$0xff]  ;;  %v536_v33 = vld [vmem:[%s678_s1 + $0xb8] sm:$0xff]   ;;  %v389_v34 = vld [vmem:[%s680_s2 + $0x1] ss:$0 sm:$0xff] }
   0xa   :  { %v415_v42 = vld [vmem:[%s680_s2 + $0x2] ss:$0 sm:$0xff] }
   0xb   :  { %456 = vmatpush3.bf16.msra.mxu0 %v515_v3  ;;  %476 = vmatpush3.bf16.msra.mxu1 %v523_v8 }
   0xc   :  { %457 = vmatprep.subr.bf16.mxu0 %v539_v0  ;;  %477 = vmatprep.subr.bf16.mxu1 %v539_v0 }
   0xf   :  { %458 = vmatpush3.bf16.msra.mxu0 %v516_v5  ;;  %478 = vmatpush3.bf16.msra.mxu1 %v524_v10 }
  0x10   :  { %459 = vmatprep.subr.bf16.mxu0 %v539_v0  ;;  %479 = vmatprep.subr.bf16.mxu1 %v539_v0 }
  0x13   :  { %460 = vmatpush3.bf16.msra.mxu0 %v517_v7  ;;  %480 = vmatpush3.bf16.msra.mxu1 %v525_v12 }
  0x14   :  { %461 = vmatprep.subr.bf16.mxu0 %v539_v0  ;;  %481 = vmatprep.subr.bf16.mxu1 %v539_v0 }
  0x17   :  { %462 = vmatpush3.bf16.msra.mxu0 %v518_v9  ;;  %482 = vmatpush3.bf16.msra.mxu1 %v526_v14 }
  0x18   :  { %463 = vmatprep.subr.bf16.mxu0 %v539_v0  ;;  %483 = vmatprep.subr.bf16.mxu1 %v539_v0 }
  0x1b   :  { %464 = vmatpush3.bf16.msra.mxu0 %v519_v11  ;;  %484 = vmatpush3.bf16.msra.mxu1 %v527_v16 }
  0x1c   :  { %465 = vmatprep.subr.bf16.mxu0 %v539_v0  ;;  %485 = vmatprep.subr.bf16.mxu1 %v539_v0 }
  0x1f   :  { %466 = vmatpush3.bf16.msra.mxu0 %v520_v13  ;;  %486 = vmatpush3.bf16.msra.mxu1 %v528_v17 }
  0x20   :  { %491 = vmatprep.subr.bf16.mxu0 %v539_v0 }
  0x22   :  { %468 = vmatmul.mubr.bf16.vlgmr.msra.gmra.mrb[0].mxu0 %v15_v15 }
  0x23   :  { %507 = vmatprep.mubr.msk.bf16.mxu0 %vm540_vm0, %v539_v0  ;;  %492 = vmatpush3.bf16.msra.mxu0 %v529_v18 }
  0x24   :  { %493 = vmatprep.subr.bf16.mxu0 %v539_v0 }
  0x27   :  { %494 = vmatpush3.bf16.msra.mxu0 %v530_v19 }
  0x28   :  { %495 = vmatprep.subr.bf16.mxu0 %v539_v0 }
  0x2b   :  { %496 = vmatpush3.bf16.msra.mxu0 %v531_v20 }
  0x2c   :  { %497 = vmatprep.subr.bf16.mxu0 %v539_v0 }
  0x2f   :  { %498 = vmatpush3.bf16.msra.mxu0 %v532_v21 }
  0x30   :  { %499 = vmatprep.subr.bf16.mxu0 %v539_v0 }
  0x33   :  { %500 = vmatpush3.bf16.msra.mxu0 %v533_v22 }
  0x34   :  { %501 = vmatprep.subr.bf16.mxu0 %v539_v0 }
  0x37   :  { %502 = vmatpush3.bf16.msra.mxu0 %v534_v23 }
  0x38   :  { %503 = vmatprep.subr.bf16.mxu0 %v539_v0 }
  0x3b   :  { %504 = vmatpush3.bf16.msra.mxu0 %v535_v32 }
  0x3c   :  { %505 = vmatprep.subr.bf16.mxu0 %v539_v0 }
  0x3f   :  { %506 = vmatpush3.bf16.msra.mxu0 %v536_v33 }
  0xf5   :  { %v121_v25 = vpop.f32.mrb[0].mxu0 }
  0xf6   :  { %v122_v26 = vadd.f32 %v363_v24, %v121_v25  ;;  %v469_v27 = vpop.f32.mrb[1].mxu0 }
  0xf7   :  { %v124_v28 = vpop.f32.mrb[2].mxu0 }
  0xf8   :  { %v127_v29 = vmax.f32 %v122_v26, 0.0  ;;  %v470_v30 = vpop.f32.mrb[3].mxu0 }
  0xfa   :  { %v128_v31 = vpack.c.bf16 %v127_v29, %v127_v29 }
  0xfc   :  { %488 = vmatmul.mubr.bf16.vlgmr.msra.gmra.mrb[0].mxu1 %v128_v31 }
 0x1cf   :  { %v236_v35 = vpop.f32.mrb[0].mxu1 }
 0x1d0   :  { %v237_v36 = vadd.f32 %v389_v34, %v236_v35  ;;  %v489_v37 = vpop.f32.mrb[1].mxu1 }
 0x1d1   :  { %v239_v38 = vpop.f32.mrb[2].mxu1 }
 0x1d2   :  { %v242_v39 = vmax.f32 %v237_v36, 0.0  ;;  %v490_v40 = vpop.f32.mrb[3].mxu1 }
 0x1d4   :  { %v243_v41 = vpack.c.bf16 %v242_v39, %v242_v39 }
 0x1d6   :  { %508 = vmatmul.mubr.bf16.vlgmr.msra.gmra.mrb[4].mxu0 %v243_v41 }
 0x2a9   :  { %v351_v43 = vpop.f32.mrb[4].mxu0 }
 0x2aa   :  { %v352_v44 = vadd.f32 %v415_v42, %v351_v43  ;;  %v509_v45 = vpop.f32.mrb[5].mxu0 }
 0x2ab   :  { %v354_v46 = vpop.f32.mrb[6].mxu0 }
 0x2ac   :  { %537 = vtanh.f32 %v352_v44  ;;  %v510_v47 = vpop.f32.mrb[7].mxu0 }
 0x2b6   :  { %v538_v48 = vpop.eup %537 }
 0x2b7   :  { %358 = vst [vmem:[%s681_s3] sm:$0xff] %v538_v48 }

</bundles_post_ra>
